<compile_context>
chip_gen: v5e
topology: v5e:2x2
jax: 0.10.0
libtpu: 0.0.40
codegen_flags: <defaults>
</compile_context>

<pallas_src>
import functools

import jax
import jax.numpy as jnp
from jax.experimental import pallas as pl
from jax.experimental.pallas import tpu as pltpu


def _round_up(v, m):
    return (v + m - 1) // m * m


def _cdiv(a, b):
    return -(-a // b)


_VMEM_CAP = None


def _vmem_capacity_bytes():
    """Physical VMEM per TensorCore; falls back to 64 MiB (v7x) if unknown."""
    global _VMEM_CAP
    if _VMEM_CAP is None:
        cap = 64 * 1024 * 1024
        try:
            info = pltpu.get_tpu_info()
            cap = int(getattr(info, "vmem_capacity_bytes", cap))
        except Exception:
            pass
        _VMEM_CAP = cap
    return _VMEM_CAP


def _vmem_budget_bytes():
    """Explicit-buffer budget: ~40 MiB on v7x (64 MiB/TC), ~80 MiB on v5e/v6e."""
    cap = _vmem_capacity_bytes()
    return max(24 << 20, min(cap * 5 // 8, 96 << 20))


def _vmem_limit_bytes(estimate):
    cap = _vmem_capacity_bytes()
    return int(min(max(estimate + (8 << 20), 32 << 20),
                   max(cap - (8 << 20), 32 << 20)))


# ----------------------------------------------------------------------------
# Conv path: F.pad(x, (0, 1, 0, 1)) + Conv2d(C, C, kernel=3, stride=2, pad=0).
#
# Space-to-depth view: the padded NHWC activation becomes (N, OH+1, OWp, 4C)
# cells; the 3x3/stride-2 conv is a 2x2/stride-1 conv over cells, i.e. a tap
# GEMM whose shifted patch rows are assembled in VMEM from [tile ; halo ; 0].
# ----------------------------------------------------------------------------
def _conv_s2d_kernel(a_ref, b_ref, w_ref, bias_ref, o_ref, ab_ref, lhs_ref, *,
                     mt, owp, c4, fuse_taps):
    # a_ref    : (1, mt, c4)  bf16   -- toh flattened s2d rows of this tile
    # b_ref    : (1, owp, c4) bf16   -- next s2d row (halo)
    # w_ref    : (1, 4*c4, tn) bf16 if fuse_taps else (4, c4, tn) bf16
    # bias_ref : (1, tn) f32
    # o_ref    : (1, mt, tn)
    # ab_ref   : (mt + owp + 8, c4) bf16 scratch: [a ; halo ; zeros]
    # lhs_ref  : fused: (mt, 4*c4) patch matrix; else (mt + owp, c4) = ab
    #            shifted down one row (so every tap read is sublane-aligned).
    @pl.when(pl.program_id(2) == 0)
    def _build_patches():
        # Built once per (n, i) row tile; reused by every Cout tile (the j grid
        # axis is "arbitrary", so the same core visits all j for this (n, i)).
        ab_ref[pl.ds(0, mt), :] = a_ref[0]
        ab_ref[pl.ds(mt, owp), :] = b_ref[0]
        ab_ref[pl.ds(mt + owp, 8), :] = jnp.zeros((8, c4), dtype=ab_ref.dtype)
        if fuse_taps:
            # Concatenate the 4 taps along K -> one full-depth GEMM below.
            for k, off in enumerate((0, 1, owp, owp + 1)):
                lhs_ref[:, k * c4:(k + 1) * c4] = ab_ref[pl.ds(off, mt), :]
        else:
            # One-row shifted copy; pays the sublane relayout once per (n, i).
            lhs_ref[...] = ab_ref[pl.ds(1, mt + owp), :]

    if fuse_taps:
        acc = jnp.dot(lhs_ref[...], w_ref[0],
                      preferred_element_type=jnp.float32)
    else:
        acc = jnp.dot(ab_ref[pl.ds(0, mt), :], w_ref[0],
                      preferred_element_type=jnp.float32)
        acc += jnp.dot(lhs_ref[pl.ds(0, mt), :], w_ref[1],
                       preferred_element_type=jnp.float32)
        acc += jnp.dot(ab_ref[pl.ds(owp, mt), :], w_ref[2],
                       preferred_element_type=jnp.float32)
        acc += jnp.dot(lhs_ref[pl.ds(owp, mt), :], w_ref[3],
                       preferred_element_type=jnp.float32)
    o_ref[0] = (acc + bias_ref[...]).astype(o_ref.dtype)


def _conv_vmem_bytes(mt, owp, c4, kk, tn, fuse_taps):
    a = 2 * mt * c4 * 2                      # double-buffered activation tile
    halo = 2 * owp * c4 * 2
    wgt = 2 * kk * tn * 2                    # weights (bf16), conservative x2
    out = 2 * mt * tn * 4                    # f32 output block, x2
    ab = (mt + owp + 8) * c4 * 2
    lhs = mt * kk * 2 if fuse_taps else (mt + owp) * c4 * 2
    return a + halo + wgt + out + ab + lhs + 8 * tn


@jax.jit
def downsample_with_conv(x, w, b):
    N, C, H, W = x.shape
    O, Cin, KH, KW = w.shape
    assert C == Cin and KH == 3 and KW == 3
    OH = (H - 2) // 2 + 1                    # output of conv on the padded map
    OW = (W - 2) // 2 + 1
    Wh = OW + 1                              # s2d cells per padded row
    OWp = _round_up(Wh, 8)                   # sublane-aligned s2d row length
    C4 = 4 * C                               # channels of one 2x2 s2d cell
    KK = 4 * C4                              # full 2x2-tap patch depth
    Cout_p = _round_up(O, 128)               # lane-dense output stores

    budget = _vmem_budget_bytes()
    # Fuse the 4 taps into a single full-K GEMM when per-tap K is shallow.
    fuse_taps = C4 < 256
    # Keep the whole weight matrix resident when it comfortably fits VMEM.
    if 2 * KK * Cout_p * 2 <= budget // 3:
        tn = Cout_p
    elif Cout_p % 256 == 0:
        tn = 256
    else:
        tn = 128

    # cdiv-based row tiler: target up to 2048-row tiles, shrink until the
    # explicit-buffer estimate fits the per-generation budget.
    toh = min(OH, max(1, 2048 // OWp))
    while toh > 1 and _conv_vmem_bytes(toh * OWp, OWp, C4, KK, tn,
                                       fuse_taps) > budget:
        toh -= 1
    grid_i = _cdiv(OH, toh)
    if N * grid_i < 2 and OH > 1:            # give both v7x TensorCores work
        toh = _cdiv(OH, 2)
        grid_i = _cdiv(OH, toh)
    OHp = grid_i * toh                       # padded row count (exact tiling)
    Mt = toh * OWp
    est = _conv_vmem_bytes(Mt, OWp, C4, KK, tn, fuse_taps)

    # --- glue (XLA): NCHW -> padded NHWC -> 2x2 space-to-depth, bf16 ---------
    # TODO(synk): keep the surrounding UNet in NHWC (and consume a bf16 /
    # uncropped output) to drop the layout transposes; the module API is NCHW.
    xp = jnp.transpose(x, (0, 2, 3, 1))
    xp = jnp.pad(xp, ((0, 0), (0, 2 * (OHp + 1) - H), (0, 2 * Wh - W), (0, 0)))
    s2d = xp.reshape(N, OHp + 1, 2, Wh, 2, C).transpose(0, 1, 3, 2, 4, 5)
    s2d = s2d.reshape(N, OHp + 1, Wh, C4)
    if OWp != Wh:
        s2d = jnp.pad(s2d, ((0, 0), (0, 0), (0, OWp - Wh), (0, 0)))
    s2d_flat = s2d.reshape(N, (OHp + 1) * OWp, C4).astype(jnp.bfloat16)

    # --- weights: (O, C, 3, 3) -> (4 taps, 4C, Cout_p) bf16, zero padded -----
    wt = jnp.transpose(w, (2, 3, 1, 0))                         # (3,3,C,O)
    wt = jnp.pad(wt, ((0, 1), (0, 1), (0, 0), (0, 0)))          # (4,4,C,O)
    wt = wt.reshape(2, 2, 2, 2, C, O).transpose(0, 2, 1, 3, 4, 5)
    wt = wt.reshape(4, C4, O)
    wt = jnp.pad(wt, ((0, 0), (0, 0), (0, Cout_p - O))).astype(jnp.bfloat16)
    if fuse_taps:
        wt = wt.reshape(1, KK, Cout_p)
    bias = jnp.pad(b, (0, Cout_p - O)).reshape(1, Cout_p).astype(jnp.float32)

    w_block = (1, KK, tn) if fuse_taps else (4, C4, tn)
    lhs_scratch = (pltpu.VMEM((Mt, KK), jnp.bfloat16) if fuse_taps
                   else pltpu.VMEM((Mt + OWp, C4), jnp.bfloat16))
    kernel = functools.partial(_conv_s2d_kernel, mt=Mt, owp=OWp, c4=C4,
                               fuse_taps=fuse_taps)
    out_flat = pl.pallas_call(
        kernel,
        out_shape=jax.ShapeDtypeStruct((N, OHp * OWp, Cout_p), x.dtype),
        grid=(N, grid_i, Cout_p // tn),
        in_specs=[
            pl.BlockSpec((1, Mt, C4), lambda n, i, j: (n, i, 0)),
            pl.BlockSpec((1, OWp, C4), lambda n, i, j: (n, (i + 1) * toh, 0)),
            pl.BlockSpec(w_block, lambda n, i, j: (0, 0, j)),
            pl.BlockSpec((1, tn), lambda n, i, j: (0, j)),
        ],
        out_specs=pl.BlockSpec((1, Mt, tn), lambda n, i, j: (n, i, j)),
        scratch_shapes=[pltpu.VMEM((Mt + OWp + 8, C4), jnp.bfloat16),
                        lhs_scratch],
        compiler_params=pltpu.CompilerParams(
            # j MUST be "arbitrary": the scratch built at j == 0 is reused by
            # every Cout tile of the same (n, i).
            dimension_semantics=("parallel", "parallel", "arbitrary"),
            vmem_limit_bytes=_vmem_limit_bytes(est)),
    )(s2d_flat, s2d_flat, wt, bias)

    out = out_flat.reshape(N, OHp, OWp, Cout_p)[:, :OH, :OW, :O]
    return jnp.transpose(out, (0, 3, 1, 2))


# ----------------------------------------------------------------------------
# No-conv path: avg_pool2d(kernel=2, stride=2), floor behavior for odd H/W.
# One f32 MXU matmul of packed row-pairs against a block-diagonal 0.25 matrix
# performs the whole 2x2 mean: no HBM intermediate, lane-dense output.
# ----------------------------------------------------------------------------
def _avgpool_kernel(x_ref, p_ref, o_ref):
    # x_ref: (tr, G*4*OW) f32 -- G packed (2 rows x 2*OW cols) input row-pairs
    # p_ref: (G*4*OW, G*OW) f32 block-diagonal pooling matrix (VMEM resident)
    o_ref[...] = jnp.dot(x_ref[...], p_ref[...],
                         preferred_element_type=jnp.float32).astype(o_ref.dtype)


def _pick_group(r, ow):
    """Output rows packed per kernel row: a divisor of r with g*ow in [128,512]."""
    target = _cdiv(128, ow)
    if target <= 1:
        return 1
    best = 1
    for g in range(1, min(r, 4096) + 1):
        if r % g or g * ow > 512:
            continue
        best = g
        if g >= target:
            break
    return best


def _pick_rowtile(rp, row_bytes):
    cap = max(1, (4 << 20) // max(row_bytes, 1))
    for d in range(min(rp, cap, 1024), 0, -1):
        if rp % d == 0 and d % 8 == 0:
            return d
    # TODO(synk): if rp is huge with no multiple-of-8 divisor, pad rp instead.
    return rp        # full extent is always a legal block shape


@jax.jit
def downsample_avgpool(x):
    N, C, H, W = x.shape
    OH, OW = H // 2, W // 2
    if H % 2 or W % 2:                       # floor behavior of F.avg_pool2d
        x = x[:, :, :2 * OH, :2 * OW]
    R = N * C * OH
    G = _pick_group(R, OW)
    Rp = R // G
    Win, Wout = G * 4 * OW, G * OW

    # Pure view: (N,C,2OH,2OW) -> (R, 4*OW) row-pairs -> (Rp, Win) packed rows.
    xp = x.reshape(Rp, Win)

    # Block-diagonal pooling matrix: exactly 0.25 at the 4 taps of each output.
    rows = jnp.arange(4 * OW)
    cols = jnp.arange(OW)
    base = ((rows[:, None] // 2) % OW == cols[None, :]).astype(jnp.float32) * 0.25
    pmat = jnp.kron(jnp.eye(G, dtype=jnp.float32), base)       # (Win, Wout)

    tr = _pick_rowtile(Rp, Win * 4)
    est = 2 * tr * Win * 4 + 2 * Win * Wout * 4 + 2 * tr * Wout * 4
    out = pl.pallas_call(
        _avgpool_kernel,
        out_shape=jax.ShapeDtypeStruct((Rp, Wout), x.dtype),
        grid=(Rp // tr,),
        in_specs=[pl.BlockSpec((tr, Win), lambda i: (i, 0)),
                  pl.BlockSpec((Win, Wout), lambda i: (0, 0))],
        out_specs=pl.BlockSpec((tr, Wout), lambda i: (i, 0)),
        compiler_params=pltpu.CompilerParams(
            dimension_semantics=("parallel",),
            vmem_limit_bytes=_vmem_limit_bytes(est)),
    )(xp, pmat)
    return out.reshape(N, C, OH, OW)


# ----------------------------------------------------------------------------
# Module-like wrapper
# ----------------------------------------------------------------------------
def downsample(x_nchw, params, with_conv):
    if with_conv:
        return downsample_with_conv(x_nchw, params["w"], params["b"])
    return downsample_avgpool(x_nchw)


def _reference_conv(x_nchw, w_oihw, bias):
    xp = jnp.pad(x_nchw, ((0, 0), (0, 0), (0, 1), (0, 1)))
    out = jax.lax.conv_general_dilated(
        xp, w_oihw, window_strides=(2, 2), padding="VALID",
        dimension_numbers=("NCHW", "OIHW", "NCHW"),
        precision=jax.lax.Precision.HIGHEST)
    return out + bias.reshape(1, -1, 1, 1)


if __name__ == "__main__":
    key = jax.random.PRNGKey(0)
    k_x, k_w, k_b, k_x2, k_w2, k_b2 = jax.random.split(key, 6)

    # --- small case: fused-tap conv path + avg-pool path ----------------------
    N, C, H, W = 2, 4, 16, 16
    x = jax.random.normal(k_x, (N, C, H, W), dtype=jnp.float32)
    w = jax.random.normal(k_w, (C, C, 3, 3), dtype=jnp.float32) * 0.1
    b = jax.random.normal(k_b, (C,), dtype=jnp.float32) * 0.1
    params = {"w": w, "b": b}

    y_conv = jax.block_until_ready(downsample(x, params, with_conv=True))
    assert y_conv.shape == (N, C, H // 2, W // 2), y_conv.shape
    y_ref = _reference_conv(x, w, b)
    assert jnp.allclose(y_conv, y_ref, atol=5e-2, rtol=5e-2), (
        float(jnp.max(jnp.abs(y_conv - y_ref))))            # bf16 MXU operands

    y_pool = jax.block_until_ready(downsample(x, params, with_conv=False))
    assert y_pool.shape == (N, C, H // 2, W // 2), y_pool.shape
    y_pool_ref = jnp.mean(x.reshape(N, C, H // 2, 2, W // 2, 2), axis=(3, 5))
    assert jnp.allclose(y_pool, y_pool_ref, atol=1e-4, rtol=1e-4), (
        float(jnp.max(jnp.abs(y_pool - y_pool_ref))))

    # --- wider-channel case: exercises the non-fused (4-tap) conv branch ------
    C2 = 64
    x2 = jax.random.normal(k_x2, (1, C2, 10, 10), dtype=jnp.float32)
    w2 = jax.random.normal(k_w2, (C2, C2, 3, 3), dtype=jnp.float32) * 0.05
    b2 = jax.random.normal(k_b2, (C2,), dtype=jnp.float32) * 0.05
    y2 = jax.block_until_ready(downsample(x2, {"w": w2, "b": b2},
                                          with_conv=True))
    y2_ref = _reference_conv(x2, w2, b2)
    assert y2.shape == y2_ref.shape, (y2.shape, y2_ref.shape)
    assert jnp.allclose(y2, y2_ref, atol=8e-2, rtol=8e-2), (
        float(jnp.max(jnp.abs(y2 - y2_ref))))

    print("KERNEL_OK")
</pallas_src>

<mosaic_0001>
module attributes {stable_mosaic.version = 11 : i64} {
  func.func @_conv_s2d_kernel(%arg0: i32, %arg1: i32, %arg2: i32, %arg3: memref<1x128x16xbf16, #tpu.memory_space<vmem>>, %arg4: memref<1x16x16xbf16, #tpu.memory_space<vmem>>, %arg5: memref<1x64x128xbf16, #tpu.memory_space<vmem>>, %arg6: memref<1x128xf32, #tpu.memory_space<vmem>>, %arg7: memref<1x128x128xf32, #tpu.memory_space<vmem>>, %arg8: memref<152x16xbf16, #tpu.memory_space<vmem>>, %arg9: memref<128x64xbf16, #tpu.memory_space<vmem>>) attributes {dimension_semantics = [#tpu.dimension_semantics<parallel>, #tpu.dimension_semantics<parallel>, #tpu.dimension_semantics<arbitrary>], iteration_bounds = array<i64: 2, 1, 1>, scalar_prefetch = 0 : i64, scratch_operands = 2 : i64, tpu.core_type = #tpu.core_type<tc>, window_params = [{transform_indices = @transform_0, window_bounds = array<i64: 1, 128, 16>}, {transform_indices = @transform_1, window_bounds = array<i64: 1, 16, 16>}, {transform_indices = @transform_2, window_bounds = array<i64: 1, 64, 128>}, {transform_indices = @transform_3, window_bounds = array<i64: 1, 128>}, {transform_indices = @transform_4, window_bounds = array<i64: 1, 128, 128>}]} {
    %c0_i32 = arith.constant 0 : i32
    %0 = arith.cmpi eq, %arg2, %c0_i32 : i32
    %1 = arith.extui %0 : i1 to i32
    %c0_i32_0 = arith.constant 0 : i32
    %2 = arith.cmpi ne, %1, %c0_i32_0 : i32
    scf.if %2 {
      %c0_10 = arith.constant 0 : index
      %c0_11 = arith.constant 0 : index
      %c0_12 = arith.constant 0 : index
      %13 = vector.load %arg3[%c0_10, %c0_11, %c0_12] : memref<1x128x16xbf16, #tpu.memory_space<vmem>>, vector<1x128x16xbf16>
      %14 = vector.shape_cast %13 : vector<1x128x16xbf16> to vector<128x16xbf16>
      %c0_13 = arith.constant 0 : index
      %c0_14 = arith.constant 0 : index
      %15 = vector.load %arg8[%c0_13, %c0_14] : memref<152x16xbf16, #tpu.memory_space<vmem>>, vector<128x16xbf16>
      tpu.vector_store %arg8[%c0_13, %c0_14], %14 {strides = array<i32>} : memref<152x16xbf16, #tpu.memory_space<vmem>>, vector<128x16xbf16>,
      %c0_15 = arith.constant 0 : index
      %c0_16 = arith.constant 0 : index
      %c0_17 = arith.constant 0 : index
      %16 = vector.load %arg4[%c0_15, %c0_16, %c0_17] : memref<1x16x16xbf16, #tpu.memory_space<vmem>>, vector<1x16x16xbf16>
      %17 = vector.shape_cast %16 : vector<1x16x16xbf16> to vector<16x16xbf16>
      %c128 = arith.constant 128 : index
      %c0_18 = arith.constant 0 : index
      %18 = vector.load %arg8[%c128, %c0_18] : memref<152x16xbf16, #tpu.memory_space<vmem>>, vector<16x16xbf16>
      tpu.vector_store %arg8[%c128, %c0_18], %17 {strides = array<i32>} : memref<152x16xbf16, #tpu.memory_space<vmem>>, vector<16x16xbf16>,
      %cst_19 = arith.constant 0.000000e+00 : bf16
      %19 = vector.broadcast %cst_19 : bf16 to vector<8x16xbf16>
      %c144 = arith.constant 144 : index
      %c0_20 = arith.constant 0 : index
      %20 = vector.load %arg8[%c144, %c0_20] : memref<152x16xbf16, #tpu.memory_space<vmem>>, vector<8x16xbf16>
      tpu.vector_store %arg8[%c144, %c0_20], %19 {strides = array<i32>} : memref<152x16xbf16, #tpu.memory_space<vmem>>, vector<8x16xbf16>,
      %c0_21 = arith.constant 0 : index
      %c0_22 = arith.constant 0 : index
      %21 = vector.load %arg8[%c0_21, %c0_22] : memref<152x16xbf16, #tpu.memory_space<vmem>>, vector<128x16xbf16>
      %c0_23 = arith.constant 0 : index
      %c0_24 = arith.constant 0 : index
      %22 = vector.load %arg9[%c0_23, %c0_24] : memref<128x64xbf16, #tpu.memory_space<vmem>>, vector<128x16xbf16>
      tpu.vector_store %arg9[%c0_23, %c0_24], %21 {strides = array<i32>} : memref<128x64xbf16, #tpu.memory_space<vmem>>, vector<128x16xbf16>,
      %c1 = arith.constant 1 : index
      %c0_25 = arith.constant 0 : index
      %23 = vector.load %arg8[%c1, %c0_25] : memref<152x16xbf16, #tpu.memory_space<vmem>>, vector<128x16xbf16>
      %c0_26 = arith.constant 0 : index
      %c16 = arith.constant 16 : index
      %24 = vector.load %arg9[%c0_26, %c16] : memref<128x64xbf16, #tpu.memory_space<vmem>>, vector<128x16xbf16>
      tpu.vector_store %arg9[%c0_26, %c16], %23 {strides = array<i32>} : memref<128x64xbf16, #tpu.memory_space<vmem>>, vector<128x16xbf16>,
      %c16_27 = arith.constant 16 : index
      %c0_28 = arith.constant 0 : index
      %25 = vector.load %arg8[%c16_27, %c0_28] : memref<152x16xbf16, #tpu.memory_space<vmem>>, vector<128x16xbf16>
      %c0_29 = arith.constant 0 : index
      %c32 = arith.constant 32 : index
      %26 = vector.load %arg9[%c0_29, %c32] : memref<128x64xbf16, #tpu.memory_space<vmem>>, vector<128x16xbf16>
      tpu.vector_store %arg9[%c0_29, %c32], %25 {strides = array<i32>} : memref<128x64xbf16, #tpu.memory_space<vmem>>, vector<128x16xbf16>,
      %c17 = arith.constant 17 : index
      %c0_30 = arith.constant 0 : index
      %27 = vector.load %arg8[%c17, %c0_30] : memref<152x16xbf16, #tpu.memory_space<vmem>>, vector<128x16xbf16>
      %c0_31 = arith.constant 0 : index
      %c48 = arith.constant 48 : index
      %28 = vector.load %arg9[%c0_31, %c48] : memref<128x64xbf16, #tpu.memory_space<vmem>>, vector<128x16xbf16>
      tpu.vector_store %arg9[%c0_31, %c48], %27 {strides = array<i32>} : memref<128x64xbf16, #tpu.memory_space<vmem>>, vector<128x16xbf16>,
    } else {
    }
    %c0 = arith.constant 0 : index
    %c0_1 = arith.constant 0 : index
    %3 = vector.load %arg9[%c0, %c0_1] : memref<128x64xbf16, #tpu.memory_space<vmem>>, vector<128x64xbf16>
    %c0_2 = arith.constant 0 : index
    %c0_3 = arith.constant 0 : index
    %c0_4 = arith.constant 0 : index
    %4 = vector.load %arg5[%c0_2, %c0_3, %c0_4] : memref<1x64x128xbf16, #tpu.memory_space<vmem>>, vector<1x64x128xbf16>
    %5 = vector.shape_cast %4 : vector<1x64x128xbf16> to vector<64x128xbf16>
    %cst = arith.constant dense<0.000000e+00> : vector<128x128xf32>
    %6 = tpu.matmul %3, %5, %cst {dimension_numbers = #tpu.dot_dimension_numbers<[1], [0], [0], [1], [0, 0, 1, 1], [], []>} : vector<128x64xbf16>, vector<64x128xbf16>, vector<128x128xf32> -> vector<128x128xf32>
    %c0_5 = arith.constant 0 : index
    %c0_6 = arith.constant 0 : index
    %7 = vector.load %arg6[%c0_5, %c0_6] : memref<1x128xf32, #tpu.memory_space<vmem>>, vector<1x128xf32>
    %8 = vector.broadcast %7 : vector<1x128xf32> to vector<128x128xf32>
    %9 = arith.addf %6, %8 : vector<128x128xf32>
    %c0_7 = arith.constant 0 : index
    %c0_8 = arith.constant 0 : index
    %c0_9 = arith.constant 0 : index
    %10 = vector.load %arg7[%c0_7, %c0_8, %c0_9] : memref<1x128x128xf32, #tpu.memory_space<vmem>>, vector<1x128x128xf32>
    %11 = vector.shape_cast %10 : vector<1x128x128xf32> to vector<128x128xf32>
    %12 = vector.shape_cast %9 : vector<128x128xf32> to vector<1x128x128xf32>
    tpu.vector_store %arg7[%c0_7, %c0_8, %c0_9], %12 {strides = array<i32>} : memref<1x128x128xf32, #tpu.memory_space<vmem>>, vector<1x128x128xf32>,
    return
  }
  func.func @transform_0(%arg0: i32, %arg1: i32, %arg2: i32) -> (i32, i32, i32) {
    %c0_i32 = arith.constant 0 : i32
    %c0_i32_0 = arith.constant 0 : i32
    return %arg0, %arg1, %c0_i32 : i32, i32, i32
  }
  func.func @transform_1(%arg0: i32, %arg1: i32, %arg2: i32) -> (i32, i32, i32) {
    %c1_i32 = arith.constant 1 : i32
    %0 = arith.addi %arg1, %c1_i32 : i32
    %c8_i32 = arith.constant 8 : i32
    %1 = arith.muli %0, %c8_i32 : i32
    %c0_i32 = arith.constant 0 : i32
    %c0_i32_0 = arith.constant 0 : i32
    return %arg0, %1, %c0_i32 : i32, i32, i32
  }
  func.func @transform_2(%arg0: i32, %arg1: i32, %arg2: i32) -> (i32, i32, i32) {
    %c0_i32 = arith.constant 0 : i32
    %c0_i32_0 = arith.constant 0 : i32
    %c0_i32_1 = arith.constant 0 : i32
    return %c0_i32, %c0_i32_0, %arg2 : i32, i32, i32
  }
  func.func @transform_3(%arg0: i32, %arg1: i32, %arg2: i32) -> (i32, i32) {
    %c0_i32 = arith.constant 0 : i32
    %c0_i32_0 = arith.constant 0 : i32
    return %c0_i32, %arg2 : i32, i32
  }
  func.func @transform_4(%arg0: i32, %arg1: i32, %arg2: i32) -> (i32, i32, i32) {
    %c0_i32 = arith.constant 0 : i32
    return %arg0, %arg1, %arg2 : i32, i32, i32
  }
}

</mosaic_0001>

<bundles_post_ra>
// kernel: downsample_with_conv.1
= control target key start
LH: loop header
LB: loop body
LE: loop exit
PB: predicated region body
PF: predicated region fallthrough
CT: control target
= control target key end

     0   :  { %s1528_s15 = smov 0   ;;  %s1530_s16 = smov 0   ;;  %s1937_s0 = inlined_call_operand.vmem [shape: bf16[2,144,16], index: 0, kind: input, shape index: {}, may-alias: {0,1}]   ;;  %s1938_s1 = inlined_call_operand.vmem [shape: bf16[2,144,16], index: 1, kind: input, shape index: {}, may-alias: {0,1}]   ;;  %s1939_s2 = inlined_call_operand.vmem [shape: bf16[1,64,128], index: 2, kind: input, shape index: {}]   ;;  %s1940_s3 = inlined_call_operand.vmem [shape: f32[1,128], index: 3, kind: input, shape index: {}]   ;;  %s1941_s4 = inlined_call_operand.vmem [shape: f32[2,128,128], index: 4, kind: output, shape index: {}]  }
   0x1   :  { %s1532_s17 = smov 0  }
   0x2 LB: > { %s33_s18 = sadd.s32 1, %s1493_s16  ;;  %p1353_p0 = scmp.ge.s32.totalorder %s1497_s17, 1  ;;  %s1497_s17 = sphi %s1532_s17, %s14_s17   ;;  %s1493_s16 = sphi %s1530_s16, %s1945_s16   ;;  %s1489_s15 = sphi %s1528_s15, %s1944_s15  }
   0x3   : > { %p35_p1 = scmp.ge.s32.totalorder %s33_s18, 2  ;;  %p242_p2 = scmp.lt.s32.totalorder %s1497_s17, 3 }
   0x5   : > { %s1947_s18 = smov (%p35_p1, %s33_s18), 0  ;;  %p243_p3 = pnand %p1353_p0, %p242_p2 }
   0x6   : > { %p306_p4 = scmp.lt.s32.totalorder (!%p243_p3), %s1489_s15, 1  ;;  %s1499_s23 = smov (!%p243_p3), 32  }
   0x7   : > { %246 = sbr.rel (%p243_p3) target bundleno = 410 (0x19a), region = 36  ;;  %s1500_s25 = smov (!%p243_p3), 16  }
   0x8   : > { %s1501_s29 = smov (!%p243_p3), 48  }
   0xc   : > { %s1949_s15 = smov (!%p306_p4, %s1489_s15), 1  ;;  %vm374_vm0 = vcmask 125952   ;;  %vm445_vm1 = vsmask.f32 3328  ;;  %vm446_vm2 = vsmask.f32 7440 }
   0xd   : > { %s1443_s19 = smul.u32 72, %s1949_s15  ;;  %vm1593_vm3 = vmor %vm445_vm1, %vm446_vm2  ;;  %vm660_vm4 = vcmask 257152   ;;  %vm757_vm5 = vcmask 388352   ;;  %vm1003_vm6 = vcmask 519552   ;;  %vm1112_vm7 = vcmask 523264   ;;  %s1418_s12 = sshll.u32 %s1949_s15, 7 }
   0xe   : > { %s1910_s21 = scalar_lea.vmem %s1941_s4, %s1418_s12 }
   0xf   : > { %s1554_s22 = scalar_lea.vmem %s1937_s0, %s1443_s19  ;;  %s1589_s24 = sadd.s32 64, %s1443_s19 }
  0x10   : > { %v373_v0 = vld [vmem:[%s1554_s22 + $0x3c] sm:$0xf]  ;;  %v372_v1 = vld [vmem:[%s1554_s22 + $0x38] sm:$0xf]  ;;  %v370_v2 = vld [vmem:[%s1554_s22 + $0x30] sm:$0xf]  ;;  %s1620_s28 = scalar_lea.vmem %s1938_s1, %s1589_s24 }
  0x11   : > { %390 = vst.msk [vmem:[#allocation2 + $0x3c] sm:$0xf] %vm374_vm0, %v373_v0  ;;  %v371_v3 = vld [vmem:[%s1554_s22 + $0x34] sm:$0xf]  ;;  %v366_v4 = vld [vmem:[%s1554_s22 + $0x20] sm:$0xf] }
  0x12   : > { %389 = vst.msk [vmem:[#allocation2 + $0x38] sm:$0xf] %vm374_vm0, %v372_v1  ;;  %v367_v5 = vld [vmem:[%s1554_s22 + $0x24] sm:$0xf]  ;;  %v368_v6 = vld [vmem:[%s1554_s22 + $0x28] sm:$0xf] }
  0x13   : > { %387 = vst.msk [vmem:[#allocation2 + $0x30] sm:$0xf] %vm374_vm0, %v370_v2  ;;  %v369_v7 = vld [vmem:[%s1554_s22 + $0x2c] sm:$0xf]  ;;  %v359_v31 = vld [vmem:[%s1554_s22 + $0x4] sm:$0xf] }
  0x14   : > { %388 = vst.msk [vmem:[#allocation2 + $0x34] sm:$0xf] %vm374_vm0, %v371_v3  ;;  %v360_v47 = vld [vmem:[%s1554_s22 + $0x8] sm:$0xf]  ;;  %v358_v48 = vld [vmem:[%s1554_s22] sm:$0xf] }
  0x15   : > { %383 = vst.msk [vmem:[#allocation2 + $0x20] sm:$0xf] %vm374_vm0, %v366_v4  ;;  %v363_v53 = vld [vmem:[%s1554_s22 + $0x14] sm:$0xf] }
  0x16   : > { %384 = vst.msk [vmem:[#allocation2 + $0x24] sm:$0xf] %vm374_vm0, %v367_v5  ;;  %v364_v5 = vld [vmem:[%s1554_s22 + $0x18] sm:$0xf] }
  0x17   : > { %385 = vst.msk [vmem:[#allocation2 + $0x28] sm:$0xf] %vm374_vm0, %v368_v6 }
  0x18   : > { %v690_v8 = vld [vmem:[#allocation2 + $0x3c] sm:$0xf]  ;;  %386 = vst.msk [vmem:[#allocation2 + $0x2c] sm:$0xf] %vm374_vm0, %v369_v7  ;;  %v391_v7 = vld [vmem:[%s1620_s28] sm:$0xf] }
  0x19   : > { %735 = vrot.lane.b32.xlu1 %v690_v8, %s1499_s23  ;;  %v689_v9 = vld [vmem:[#allocation2 + $0x38] sm:$0xf]  ;;  %v1576_v16 = vld [vmem:[#allocation2 + $0x3c] sm:$0xf]  ;;  %376 = vst.msk [vmem:[#allocation2 + $0x4] sm:$0xf] %vm374_vm0, %v359_v31 }
  0x1a   : > { %v1573_v10 = vld [vmem:[#allocation2 + $0x38] sm:$0xf]  ;;  %733 = vrot.lane.b32.xlu0 %v689_v9, %s1499_s23  ;;  %v440_v11 = vld [vmem:[#allocation2 + $0x30] sm:$0xf]  ;;  %v921_v41 = vshll.u32 %v1576_v16, 16  ;;  %v925_v51 = vshrl.u32 %v1576_v16, 16 }
  0x1b   : > { %v441_v12 = vld [vmem:[#allocation2 + $0x34] sm:$0xf]  ;;  %v568_v13 = vshll.u32 %v440_v11, 16  ;;  %v572_v14 = vshrl.u32 %v440_v11, 16  ;;  %v786_v15 = vld [vmem:[#allocation2 + $0x38] sm:$0xf] }
  0x1c   : > { %v578_v17 = vshll.u32 %v441_v12, 16  ;;  %v582_v18 = vshrl.u32 %v441_v12, 16  ;;  %v436_v19 = vld [vmem:[#allocation2 + $0x20] sm:$0xf]  ;;  %v588_v20 = vshll.u32 %v1573_v10, 16  ;;  %v911_v30 = vshll.u32 %v786_v15, 16 }
  0x1d   : > { %v1579_v21 = vrot.slane %v568_v13, 5  ;;  %v574_v22 = vrot.slane %v572_v14, 4  ;;  %v437_v23 = vld [vmem:[#allocation2 + $0x24] sm:$0xf]  ;;  %v528_v24 = vshll.u32 %v436_v19, 16  ;;  %v532_v25 = vshrl.u32 %v436_v19, 16 }
  0x1e   : > { %v538_v26 = vshll.u32 %v437_v23, 16  ;;  %v542_v27 = vshrl.u32 %v437_v23, 16  ;;  %v584_v28 = vrot.slane %v582_v18, 4  ;;  %v1581_v29 = vld [vmem:[#allocation2 + $0x28] sm:$0xf]  ;;  %v580_v33 = vrot.slane %v578_v17, 5 }
  0x1f   : > { %v575_v32 = vor.u32 %v574_v22, %v1579_v21  ;;  %v1585_v34 = vrot.slane %v528_v24, 5  ;;  %v534_v35 = vrot.slane %v532_v25, 4  ;;  %v685_v36 = vld [vmem:[#allocation2 + $0x28] sm:$0xf]  ;;  %v915_v40 = vshrl.u32 %v786_v15, 16 }
  0x20   : > { %v540_v38 = vrot.slane %v538_v26, 5  ;;  %v544_v39 = vrot.slane %v542_v27, 4  ;;  %725 = vrot.lane.b32.xlu2 %v685_v36, %s1499_s23  ;;  %v783_v42 = vld [vmem:[#allocation2 + $0x2c] sm:$0xf]  ;;  %v585_v45 = vor.u32 %v584_v28, %v580_v33  ;;  %v548_v46 = vshll.u32 %v1581_v29, 16 }
  0x21   : > { %v576_v43 = vrot.slane %v575_v32, 4  ;;  %v535_v44 = vor.u32 %v534_v35, %v1585_v34  ;;  %v1603_v49 = vrot.slane %v588_v20, 5  ;;  %v881_v52 = vshll.u32 %v783_v42, 16  ;;  %v782_v57 = vld [vmem:[#allocation2 + $0x28] sm:$0xf] }
  0x22   : > { %v545_v50 = vor.u32 %v544_v39, %v540_v38  ;;  %v885_v56 = vshrl.u32 %v783_v42, 16  ;;  %v1611_v58 = vrot.slane %v911_v30, 5  ;;  %v917_v59 = vrot.slane %v915_v40, 4  ;;  %v1613_v60 = vld [vmem:[#allocation2 + $0x30] sm:$0xf] }
  0x23   : > { %v581_v54 = vsel %vm1593_vm3, %v576_v43, %v580_v33  ;;  %v536_v55 = vrot.slane %v535_v44, 4  ;;  %377 = vst.msk [vmem:[#allocation2 + $0x8] sm:$0xf] %vm374_vm0, %v360_v47  ;;  %v586_v62 = vrot.slane %v585_v45, 4  ;;  %v1624_v63 = vrot.slane %v548_v46, 5 }
  0x24   : > { %636 = vrot.lane.b32.xlu1 %v581_v54, %s1500_s25  ;;  %v686_v0 = vld [vmem:[#allocation2 + $0x2c] sm:$0xf]  ;;  %375 = vst.msk [vmem:[#allocation2] sm:$0xf] %vm374_vm0, %v358_v48  ;;  %v546_v1 = vrot.slane %v545_v50, 4  ;;  %v883_v2 = vrot.slane %v881_v52, 5  ;;  %v918_v9 = vor.u32 %v917_v59, %v1611_v58 }
  0x25   : > { %v541_v61 = vsel %vm1593_vm3, %v536_v55, %v540_v38  ;;  %v871_v3 = vshll.u32 %v782_v57, 16  ;;  %v875_v4 = vshrl.u32 %v782_v57, 16  ;;  %v887_v6 = vrot.slane %v885_v56, 4  ;;  %380 = vst.msk [vmem:[#allocation2 + $0x14] sm:$0xf] %vm374_vm0, %v363_v53 }
  0x26   : > { %628 = vrot.lane.b32.xlu0 %v541_v61, %s1500_s25  ;;  %v927_v8 = vrot.slane %v925_v51, 4  ;;  %381 = vst.msk [vmem:[#allocation2 + $0x18] sm:$0xf] %vm374_vm0, %v364_v5  ;;  %v365_v13 = vld [vmem:[%s1554_s22 + $0x1c] sm:$0xf]  ;;  %v591_v14 = vsel %vm1593_vm3, %v586_v62, %v1603_v49  ;;  %v923_v15 = vrot.slane %v921_v41, 5  ;;  %v551_v20 = vsel %vm1593_vm3, %v546_v1, %v1624_v63 }
  0x27   : > { %v1633_v11 = vrot.slane %v871_v3, 5  ;;  %v877_v12 = vrot.slane %v875_v4, 4  ;;  %v891_v16 = vshll.u32 %v1613_v60, 16  ;;  %393 = vst.msk [vmem:[#allocation2 + $0x40] sm:$0xf] %vm374_vm0, %v391_v7  ;;  %v888_v22 = vor.u32 %v887_v6, %v883_v2 }
  0x28   : > { %727 = vrot.lane.b32.xlu2 %v686_v0, %s1499_s23  ;;  %v429_v17 = vld [vmem:[#allocation2 + $0x4] sm:$0xf]  ;;  %382 = vst.msk [vmem:[#allocation2 + $0x1c] sm:$0xf] %vm374_vm0, %v365_v13  ;;  %v362_v19 = vld [vmem:[%s1554_s22 + $0x10] sm:$0xf]  ;;  %v928_v31 = vor.u32 %v927_v8, %v923_v15 }
  0x29   : > { %v878_v18 = vor.u32 %v877_v12, %v1633_v11  ;;  %v458_v23 = vshll.u32 %v429_v17, 16  ;;  %v462_v24 = vshrl.u32 %v429_v17, 16  ;;  %v361_v25 = vld [vmem:[%s1554_s22 + $0xc] sm:$0xf]  ;;  %v919_v26 = vrot.slane %v918_v9, 4 }
  0x2a   : > { %v1650_v27 = vld [vmem:[#allocation2 + $0x8] sm:$0xf]  ;;  %379 = vst.msk [vmem:[#allocation2 + $0x10] sm:$0xf] %vm374_vm0, %v362_v19  ;;  %v889_v39 = vrot.slane %v888_v22, 4  ;;  %v1657_v40 = vrot.slane %v891_v16, 5 }
  0x2b   : > { %v428_v28 = vld [vmem:[#allocation2] sm:$0xf]  ;;  %v879_v30 = vrot.slane %v878_v18, 4  ;;  %v460_v32 = vrot.slane %v458_v23, 5  ;;  %v464_v33 = vrot.slane %v462_v24, 4  ;;  %v468_v44 = vshll.u32 %v1650_v27, 16 }
  0x2c   : > { %638 = vrot.lane.b32.xlu1 %v591_v14, %s1500_s25  ;;  %v449_v35 = vshrl.u32 %v428_v28, 16  ;;  %v452_v36 = vshll.u32 %v428_v28, 16  ;;  %378 = vst.msk [vmem:[#allocation2 + $0xc] sm:$0xf] %vm374_vm0, %v361_v25  ;;  %v433_v43 = vld [vmem:[#allocation2 + $0x14] sm:$0xf]  ;;  %v924_v46 = vsel %vm1593_vm3, %v919_v26, %v923_v15  ;;  %v894_v52 = vsel %vm1593_vm3, %v889_v39, %v1657_v40 }
  0x2d   : > { %v884_v38 = vsel %vm1593_vm3, %v879_v30, %v883_v2  ;;  %v465_v47 = vor.u32 %v464_v33, %v460_v32  ;;  %v929_v48 = vrot.slane %v928_v31, 4  ;;  %v498_v51 = vshll.u32 %v433_v43, 16  ;;  %v1680_v6 = vld [vmem:[#allocation2 + $0x18] sm:$0xf]  ;;  %v774_v15 = vld [vmem:[#allocation2 + $0x8] sm:$0xf] }
  0x2e   : > { %630 = vrot.lane.b32.xlu0 %v551_v20, %s1500_s25  ;;  %v451_v41 = vrot.slane %v449_v35, 4  ;;  %v454_v42 = vrot.slane %v452_v36, 5  ;;  %v1661_v45 = vld [vmem:[#allocation2 + $0x40] sm:$0xf]  ;;  %v502_v54 = vshrl.u32 %v433_v43, 16  ;;  %v1672_v56 = vrot.slane %v468_v44, 5 }
  0x2f   : > { %v931_v50 = vshll.u32 %v1661_v45, 16  ;;  %v466_v59 = vrot.slane %v465_v47, 4  ;;  %v500_v1 = vrot.slane %v498_v51, 5  ;;  %v508_v13 = vshll.u32 %v1680_v6, 16  ;;  %v778_v17 = vld [vmem:[#allocation2 + $0x18] sm:$0xf] }
  0x30   : > { %971 = vrot.lane.b32.xlu2 %v884_v38, %s1501_s29  ;;  %v455_v53 = vor.u32 %v454_v42, %v451_v41  ;;  %v504_v3 = vrot.slane %v502_v54, 4  ;;  %v792_v18 = vshrl.u32 %v774_v15, 16  ;;  %v795_v19 = vshll.u32 %v774_v15, 16  ;;  %v677_v26 = vld [vmem:[#allocation2 + $0x8] sm:$0xf] }
  0x31   : > { %v1669_v55 = vrot.slane %v931_v50, 5  ;;  %v432_v57 = vld [vmem:[#allocation2 + $0x10] sm:$0xf]  ;;  %v471_v7 = vsel %vm1593_vm3, %v466_v59, %v1672_v56  ;;  %v1694_v22 = vrot.slane %v508_v13, 5  ;;  %v831_v23 = vshll.u32 %v778_v17, 16 }
  0x32   : > { %v488_v62 = vshll.u32 %v432_v57, 16  ;;  %v492_v0 = vshrl.u32 %v432_v57, 16  ;;  %v456_v2 = vrot.slane %v455_v53, 4  ;;  %v505_v12 = vor.u32 %v504_v3, %v500_v1  ;;  %v779_v35 = vld [vmem:[#allocation2 + $0x1c] sm:$0xf] }
  0x33   : > { %v934_v61 = vsel %vm1593_vm3, %v929_v48, %v1669_v55  ;;  %v835_v24 = vshrl.u32 %v778_v17, 16  ;;  %v775_v25 = vld [vmem:[#allocation2 + $0xc] sm:$0xf]  ;;  %v794_v28 = vrot.slane %v792_v18, 4  ;;  %v797_v30 = vrot.slane %v795_v19, 5 }
  0x34   : > { %979 = vrot.lane.b32.xlu1 %v924_v46, %s1501_s29  ;;  %v1678_v4 = vrot.slane %v488_v62, 5  ;;  %v494_v5 = vrot.slane %v492_v0, 4  ;;  %v461_v9 = vsel %vm1593_vm3, %v456_v2, %v460_v32  ;;  %v506_v20 = vrot.slane %v505_v12, 4  ;;  %v678_v39 = vld [vmem:[#allocation2 + $0xc] sm:$0xf] }
  0x35   : > { %v801_v32 = vshll.u32 %v775_v25, 16  ;;  %v805_v33 = vshrl.u32 %v775_v25, 16  ;;  %v1701_v36 = vrot.slane %v831_v23, 5  ;;  %v837_v38 = vrot.slane %v835_v24, 4  ;;  %v439_v42 = vld [vmem:[#allocation2 + $0x2c] sm:$0xf] }
  0x36   : > { %973 = vrot.lane.b32.xlu0 %v894_v52, %s1501_s29  ;;  %v495_v8 = vor.u32 %v494_v5, %v1678_v4  ;;  %v511_v31 = vsel %vm1593_vm3, %v506_v20, %v1694_v22  ;;  %v845_v41 = vshrl.u32 %v779_v35, 16  ;;  %v798_v43 = vor.u32 %v797_v30, %v794_v28  ;;  %v392_v44 = vld [vmem:[%s1620_s28 + $0x4] sm:$0xf]  ;;  %v1707_v51 = vld [vmem:[#allocation2 + $0x10] sm:$0xf] }
  0x37   : > { %394 = vst.msk [vmem:[#allocation2 + $0x44] sm:$0xf] %vm374_vm0, %v392_v44  ;;  %v841_v46 = vshll.u32 %v779_v35, 16  ;;  %v803_v47 = vrot.slane %v801_v32, 5  ;;  %v807_v48 = vrot.slane %v805_v33, 4  ;;  %v838_v50 = vor.u32 %v837_v38, %v1701_v36 }
  0x38   : > { %981 = vrot.lane.b32.xlu2 %v934_v61, %s1501_s29  ;;  %v496_v14 = vrot.slane %v495_v8, 4  ;;  %v558_v52 = vshll.u32 %v439_v42, 16  ;;  %v682_v53 = vld [vmem:[#allocation2 + $0x1c] sm:$0xf]  ;;  %v562_v54 = vshrl.u32 %v439_v42, 16  ;;  %v799_v57 = vrot.slane %v798_v43, 4 }
  0x39   : > { %v847_v59 = vrot.slane %v845_v41, 4  ;;  %v1710_v61 = vld [vmem:[#allocation2 + $0x20] sm:$0xf]  ;;  %v552_v62 = vshrl.u32 %v1581_v29, 16  ;;  %v681_v0 = vld [vmem:[#allocation2 + $0x18] sm:$0xf]  ;;  %v808_v2 = vor.u32 %v807_v48, %v803_v47 }
  0x3a   : > { %v501_v16 = vsel %vm1593_vm3, %v496_v14, %v500_v1  ;;  %v843_v1 = vrot.slane %v841_v46, 5  ;;  %v811_v3 = vshll.u32 %v1707_v51, 16  ;;  %v592_v5 = vshrl.u32 %v1573_v10, 16  ;;  %v443_v17 = vld [vmem:[#allocation2 + $0x3c] sm:$0xf] }
  0x3b   : > { %v560_v8 = vrot.slane %v558_v52, 5  ;;  %v804_v12 = vsel %vm1593_vm3, %v799_v57, %v803_v47  ;;  %v851_v14 = vshll.u32 %v1710_v61, 16  ;;  %v809_v29 = vrot.slane %v808_v2, 4  ;;  %v687_v52 = vld [vmem:[#allocation2 + $0x30] sm:$0xf] }
  0x3c   : > { %614 = vrot.lane.b32.xlu1 %v471_v7, %s1500_s25  ;;  %v839_v7 = vrot.slane %v838_v50, 4  ;;  %v848_v13 = vor.u32 %v847_v59, %v843_v1  ;;  %v1720_v15 = vrot.slane %v811_v3, 5  ;;  %v594_v23 = vrot.slane %v592_v5, 4  ;;  %v688_v2 = vld [vmem:[#allocation2 + $0x34] sm:$0xf] }
  0x3d   : > { %v1725_v20 = vrot.slane %v851_v14, 5  ;;  %v602_v28 = vshrl.u32 %v443_v17, 16  ;;  %v935_v50 = vshrl.u32 %v1661_v45, 16  ;;  %v431_v45 = vld [vmem:[#allocation2 + $0xc] sm:$0xf] }
  0x3e   : > { %612 = vrot.lane.b32.xlu0 %v461_v9, %s1500_s25  ;;  %v564_v9 = vrot.slane %v562_v54, 4  ;;  %v844_v10 = vsel %vm1593_vm3, %v839_v7, %v843_v1  ;;  %v849_v19 = vrot.slane %v848_v13, 4  ;;  %v814_v24 = vsel %vm1593_vm3, %v809_v29, %v1720_v15  ;;  %v692_v13 = vld [vmem:[#allocation2 + $0x44] sm:$0xf] }
  0x3f   : > { %v595_v32 = vor.u32 %v594_v23, %v1603_v49  ;;  %v604_v38 = vrot.slane %v602_v28, 4  ;;  %v895_v49 = vshrl.u32 %v1613_v60, 16  ;;  %v1502_v54 = vmov 0  }
  0x40   : > { %620 = vrot.lane.b32.xlu2 %v501_v16, %s1500_s25  ;;  %v554_v16 = vrot.slane %v552_v62, 4  ;;  %v565_v18 = vor.u32 %v564_v9, %v560_v8  ;;  %395 = vst.msk [vmem:[#allocation2 + $0x48] sm:$0xf] %vm374_vm0, %v1502_v54  ;;  %v789_v62 = vld [vmem:[#allocation2 + $0x44] sm:$0xf]  ;;  %v482_v14 = vshrl.u32 %v431_v45, 16 }
  0x41   : > { %v596_v41 = vrot.slane %v595_v32, 4  ;;  %v945_v1 = vshrl.u32 %v789_v62, 16  ;;  %v941_v5 = vshll.u32 %v789_v62, 16  ;;  %v512_v23 = vshrl.u32 %v1680_v6, 16  ;;  %v435_v6 = vld [vmem:[#allocation2 + $0x1c] sm:$0xf] }
  0x42   : > { %v555_v25 = vor.u32 %v554_v16, %v1624_v63  ;;  %v566_v30 = vrot.slane %v565_v18, 4  ;;  %v691_v18 = vld [vmem:[#allocation2 + $0x40] sm:$0xf]  ;;  %v405_v62 = vld [vmem:[#allocation2 + $0x24] sm:$0xf] }
  0x43   : > { %v947_v16 = vrot.slane %v945_v1, 4  ;;  %421 = vst.msk [vmem:[#allocation3 + $0x24] sm:$0xf] %vm374_vm0, %v405_v62  ;;  %v855_v1 = vshrl.u32 %v1710_v61, 16  ;;  %v1429_v61 = vld [vmem:[%s1939_s2 + $0x10] sm:$0xff] }
  0x44   : > { %709 = vrot.lane.b32.xlu1 %v677_v26, %s1499_s23  ;;  %v598_v26 = vshll.u32 %v443_v17, 16  ;;  %v556_v33 = vrot.slane %v555_v25, 4  ;;  %v571_v63 = vsel %vm1593_vm3, %v566_v30, %v1579_v21  ;;  %v785_v21 = vld [vmem:[#allocation2 + $0x34] sm:$0xf] }
  0x45   : > { %v901_v57 = vshll.u32 %v785_v21, 16  ;;  %v905_v59 = vshrl.u32 %v785_v21, 16  ;;  %v404_v21 = vld [vmem:[#allocation2 + $0x20] sm:$0xf] }
  0x46   : > { %622 = vrot.lane.b32.xlu0 %v511_v31, %s1500_s25  ;;  %v854_v31 = vsel %vm1593_vm3, %v849_v19, %v1725_v20  ;;  %v600_v35 = vrot.slane %v598_v26, 5  ;;  %v561_v42 = vsel %vm1593_vm3, %v556_v33, %v560_v8  ;;  %v943_v19 = vrot.slane %v941_v5, 5  ;;  %420 = vst.msk [vmem:[#allocation3 + $0x20] sm:$0xf] %vm374_vm0, %v404_v21 }
  0x47   : > { %v903_v7 = vrot.slane %v901_v57, 5  ;;  %v907_v8 = vrot.slane %v905_v59, 4  ;;  %v790_v17 = vld [vmem:[#allocation2 + $0x48] sm:$0x1]  ;;  %v815_v57 = vshrl.u32 %v1707_v51, 16 }
  0x48   : > { %711 = vrot.lane.b32.xlu2 %v678_v39, %s1499_s23  ;;  %v444_v39 = vld [vmem:[#allocation2 + $0x40] sm:$0x1]  ;;  %v605_v43 = vor.u32 %v604_v38, %v600_v35  ;;  %v601_v46 = vsel %vm1593_vm3, %v596_v41, %v600_v35  ;;  %v948_v28 = vor.u32 %v947_v16, %v943_v19  ;;  %v951_v30 = vshll.u32 %v790_v17, 16  ;;  %v684_v17 = vld [vmem:[#allocation2 + $0x24] sm:$0xf] }
  0x49   : > { %v608_v44 = vshll.u32 %v444_v39, 16  ;;  %v514_v39 = vrot.slane %v512_v23, 4  ;;  %v817_v51 = vrot.slane %v815_v57, 4  ;;  %v400_v23 = vld [vmem:[#allocation2 + $0x10] sm:$0xf] }
  0x4a   : > { %v606_v47 = vrot.slane %v605_v43, 4  ;;  %v949_v35 = vrot.slane %v948_v28, 4  ;;  %v953_v38 = vrot.slane %v951_v30, 5  ;;  %v522_v43 = vshrl.u32 %v435_v6, 16  ;;  %416 = vst.msk [vmem:[#allocation3 + $0x10] sm:$0xf] %vm374_vm0, %v400_v23 }
  0x4b   : > { %v610_v48 = vrot.slane %v608_v44, 5 }
  0x4c   : > { %719 = vrot.lane.b32.xlu1 %v682_v53, %s1499_s23  ;;  %v897_v53 = vrot.slane %v895_v49, 4  ;;  %v954_v49 = vsel %vm1593_vm3, %v949_v35, %v953_v38  ;;  %v396_v35 = vld [vmem:[#allocation2] sm:$0xf] }
  0x4d   : > { %v611_v60 = vsel %vm1593_vm3, %v606_v47, %v610_v48  ;;  %v408_v48 = vld [vmem:[#allocation2 + $0x30] sm:$0xf]  ;;  %412 = vst.msk [vmem:[#allocation3] sm:$0xf] %vm374_vm0, %v396_v35 }
  0x4e   : > { %717 = vrot.lane.b32.xlu0 %v681_v0, %s1499_s23  ;;  %v937_v0 = vrot.slane %v935_v50, 4  ;;  %v898_v3 = vor.u32 %v897_v53, %v1657_v40  ;;  %v908_v40 = vor.u32 %v907_v8, %v903_v7  ;;  %424 = vst.msk [vmem:[#allocation3 + $0x30] sm:$0xf] %vm374_vm0, %v408_v48  ;;  %v409_v53 = vld [vmem:[#allocation2 + $0x34] sm:$0xf] }
  0x4f   : > { %425 = vst.msk [vmem:[#allocation3 + $0x34] sm:$0xf] %vm374_vm0, %v409_v53  ;;  %v406_v53 = vld [vmem:[#allocation2 + $0x28] sm:$0xf] }
  0x50   : > { %955 = vrot.lane.b32.xlu2 %v804_v12, %s1501_s29  ;;  %v938_v9 = vor.u32 %v937_v0, %v1669_v55  ;;  %v478_v12 = vshll.u32 %v431_v45, 16  ;;  %v899_v29 = vrot.slane %v898_v3, 4  ;;  %v484_v55 = vrot.slane %v482_v14, 4  ;;  %v777_v0 = vld [vmem:[#allocation2 + $0x14] sm:$0xf]  ;;  %v1430_v45 = vld [vmem:[%s1939_s2 + $0x18] sm:$0xff] }
  0x51   : > { %v825_v8 = vshrl.u32 %v777_v0, 16  ;;  %1432 = vmatpush.bf16.msra.mxu2 %v1430_v45  ;;  %1433 = vmatpush.bf16.msra.mxu3 %v1430_v45  ;;  %v680_v14 = vld [vmem:[#allocation2 + $0x14] sm:$0xf]  ;;  %422 = vst.msk [vmem:[#allocation3 + $0x28] sm:$0xf] %vm374_vm0, %v406_v53 }
  0x52   : > { %v480_v25 = vrot.slane %v478_v12, 5  ;;  %v904_v26 = vsel %vm1593_vm3, %v899_v29, %v903_v7  ;;  %v821_v7 = vshll.u32 %v777_v0, 16  ;;  %1141 = vmatpush.bf16.msra.mxu0 %v1430_v45  ;;  %v857_v12 = vrot.slane %v855_v1, 4  ;;  %1431 = vmatpush.bf16.msra.mxu1 %v1430_v45 }
  0x53   : > { %v818_v29 = vor.u32 %v817_v51, %v1720_v15 }
  0x54   : > { %963 = vrot.lane.b32.xlu1 %v844_v10, %s1501_s29  ;;  %v472_v10 = vshrl.u32 %v1650_v27, 16  ;;  %v909_v27 = vrot.slane %v908_v40, 4  ;;  %v485_v33 = vor.u32 %v484_v55, %v480_v25  ;;  %v823_v16 = vrot.slane %v821_v7, 5  ;;  %v1428_v40 = vld [vmem:[%s1939_s2 + $0x8] sm:$0xff] }
  0x55   : > { %1435 = vmatpush.bf16.msra.mxu2 %v1429_v61  ;;  %1436 = vmatpush.bf16.msra.mxu3 %v1429_v61 }
  0x56   : > { %957 = vrot.lane.b32.xlu0 %v814_v24, %s1501_s29  ;;  %v939_v24 = vrot.slane %v938_v9, 4  ;;  %v914_v41 = vsel %vm1593_vm3, %v909_v27, %v1611_v58  ;;  %v486_v44 = vrot.slane %v485_v33, 4  ;;  %v781_v9 = vld [vmem:[#allocation2 + $0x24] sm:$0xf]  ;;  %1142 = vmatpush.bf16.msra.mxu0 %v1429_v61 }
  0x57   : > { %1434 = vmatpush.bf16.msra.mxu1 %v1429_v61 }
  0x58   : > { %965 = vrot.lane.b32.xlu2 %v854_v31, %s1501_s29  ;;  %v474_v31 = vrot.slane %v472_v10, 4  ;;  %v944_v32 = vsel %vm1593_vm3, %v939_v24, %v943_v19  ;;  %v491_v58 = vsel %vm1593_vm3, %v486_v44, %v1678_v4  ;;  %v827_v10 = vrot.slane %v825_v8, 4 }
  0x59   : > { %v819_v19 = vrot.slane %v818_v29, 4  ;;  %1438 = vmatpush.bf16.msra.mxu2 %v1428_v40  ;;  %1439 = vmatpush.bf16.msra.mxu3 %v1428_v40 }
  0x5a   : > { %1143 = vmatpush.bf16.msra.mxu0 %v1428_v40 }
  0x5b   : > { %1437 = vmatpush.bf16.msra.mxu1 %v1428_v40 }
  0x5c   : > { %634 = vrot.lane.b32.xlu1 %v571_v63, %s1500_s25  ;;  %v475_v63 = vor.u32 %v474_v31, %v1672_v56  ;;  %v524_v56 = vrot.slane %v522_v43, 4  ;;  %v824_v31 = vsel %vm1593_vm3, %v819_v19, %v823_v16 }
  0x5e   : > { %632 = vrot.lane.b32.xlu0 %v561_v42, %s1500_s25  ;;  %v518_v42 = vshll.u32 %v435_v6, 16  ;;  %v476_v47 = vrot.slane %v475_v63, 4  ;;  %v397_v6 = vld [vmem:[#allocation2 + $0x4] sm:$0xf] }
  0x5f   : > { %413 = vst.msk [vmem:[#allocation3 + $0x4] sm:$0xf] %vm374_vm0, %v397_v6 }
  0x60   : > { %640 = vrot.lane.b32.xlu2 %v601_v46, %s1500_s25  ;;  %v515_v46 = vor.u32 %v514_v39, %v1694_v22  ;;  %v520_v50 = vrot.slane %v518_v42, 5  ;;  %v481_v54 = vsel %vm1593_vm3, %v476_v47, %v480_v25  ;;  %v683_v25 = vld [vmem:[#allocation2 + $0x20] sm:$0xf] }
  0x64   : > { %729 = vrot.lane.b32.xlu1 %v687_v52, %s1499_s23  ;;  %v516_v52 = vrot.slane %v515_v46, 4 }
  0x66   : > { %642 = vrot.lane.b32.xlu0 %v611_v60, %s1500_s25  ;;  %v525_v60 = vor.u32 %v524_v56, %v520_v50  ;;  %v521_v59 = vsel %vm1593_vm3, %v516_v52, %v520_v50  ;;  %v410_v50 = vld [vmem:[#allocation2 + $0x38] sm:$0xf]  ;;  %v407_v56 = vld [vmem:[#allocation2 + $0x2c] sm:$0xf] }
  0x67   : > { %426 = vst.msk [vmem:[#allocation3 + $0x38] sm:$0xf] %vm374_vm0, %v410_v50 }
  0x68   : > { %731 = vrot.lane.b32.xlu2 %v688_v2, %s1499_s23  ;;  %v526_v4 = vrot.slane %v525_v60, 4  ;;  %v679_v2 = vld [vmem:[#allocation2 + $0x10] sm:$0xf]  ;;  %423 = vst.msk [vmem:[#allocation3 + $0x2c] sm:$0xf] %vm374_vm0, %v407_v56 }
  0x6a   : > { %v531_v5 = vsel %vm1593_vm3, %v526_v4, %v1585_v34  ;;  %v861_v34 = vshll.u32 %v781_v9, 16 }
  0x6c   : > { %739 = vrot.lane.b32.xlu1 %v692_v13, %s1499_s23  ;;  %v865_v13 = vshrl.u32 %v781_v9, 16  ;;  %v863_v55 = vrot.slane %v861_v34, 5  ;;  %v398_v9 = vld [vmem:[#allocation2 + $0x8] sm:$0xf]  ;;  %v403_v34 = vld [vmem:[#allocation2 + $0x1c] sm:$0xf] }
  0x6d   : > { %414 = vst.msk [vmem:[#allocation3 + $0x8] sm:$0xf] %vm374_vm0, %v398_v9 }
  0x6e   : > { %737 = vrot.lane.b32.xlu0 %v691_v18, %s1499_s23  ;;  %v858_v18 = vor.u32 %v857_v12, %v1725_v20  ;;  %v867_v15 = vrot.slane %v865_v13, 4  ;;  %v1427_v20 = vld [vmem:[%s1939_s2] sm:$0xff]  ;;  %419 = vst.msk [vmem:[#allocation3 + $0x1c] sm:$0xf] %vm374_vm0, %v403_v34 }
  0x6f   : > { %1441 = vmatpush.bf16.msra.mxu2 %v1427_v20  ;;  %1442 = vmatpush.bf16.msra.mxu3 %v1427_v20 }
  0x70   : > { %975 = vrot.lane.b32.xlu2 %v904_v26, %s1501_s29  ;;  %v828_v26 = vor.u32 %v827_v10, %v823_v16  ;;  %v859_v30 = vrot.slane %v858_v18, 4  ;;  %v868_v27 = vor.u32 %v867_v15, %v863_v55  ;;  %1144 = vmatpush.bf16.msra.mxu0 %v1427_v20 }
  0x71   : > { %1440 = vmatpush.bf16.msra.mxu1 %v1427_v20 }
  0x72   : > { %v829_v33 = vrot.slane %v828_v26, 4  ;;  %v864_v38 = vsel %vm1593_vm3, %v859_v30, %v863_v55  ;;  %v869_v39 = vrot.slane %v868_v27, 4 }
  0x74   : > { %983 = vrot.lane.b32.xlu1 %v944_v32, %s1501_s29  ;;  %v874_v42 = vsel %vm1593_vm3, %v869_v39, %v1633_v11 }
  0x76   : > { %977 = vrot.lane.b32.xlu0 %v914_v41, %s1501_s29  ;;  %v834_v41 = vsel %vm1593_vm3, %v829_v33, %v1701_v36 }
  0x78   : > { %985 = vrot.lane.b32.xlu2 %v954_v49, %s1501_s29  ;;  %v401_v49 = vld [vmem:[#allocation2 + $0x14] sm:$0xf] }
  0x79   : > { %417 = vst.msk [vmem:[#allocation3 + $0x14] sm:$0xf] %vm374_vm0, %v401_v49 }
  0x7a   : > { %v1782_v22 = vpop.permute.xlu2 %725 }
  0x7c   : > { %618 = vrot.lane.b32.xlu1 %v491_v58, %s1500_s25 }
  0x7e   : > { %616 = vrot.lane.b32.xlu0 %v481_v54, %s1500_s25 }
  0x80   : > { %624 = vrot.lane.b32.xlu2 %v521_v59, %s1500_s25  ;;  %v411_v59 = vld [vmem:[#allocation2 + $0x3c] sm:$0xf] }
  0x81   : > { %427 = vst.msk [vmem:[#allocation3 + $0x3c] sm:$0xf] %vm374_vm0, %v411_v59 }
  0x82   : > { %v1798_v3 = vpop.permute.xlu2 %727 }
  0x84   : > { %713 = vrot.lane.b32.xlu1 %v679_v2, %s1499_s23 }
  0x86   : > { %626 = vrot.lane.b32.xlu0 %v531_v5, %s1500_s25  ;;  %v399_v5 = vld [vmem:[#allocation2 + $0xc] sm:$0xf] }
  0x87   : > { %415 = vst.msk [vmem:[#allocation3 + $0xc] sm:$0xf] %vm374_vm0, %v399_v5 }
  0x88   : > { %715 = vrot.lane.b32.xlu2 %v680_v14, %s1499_s23 }
  0x8a   : > { %v972_v24 = vpop.permute.xlu2 %971 }
  0x8b   : > { %v736_v28 = vpop.permute.xlu1 %735 }
  0x8c   : > { %723 = vrot.lane.b32.xlu1 %v684_v17, %s1499_s23  ;;  %v734_v32 = vpop.permute.xlu0 %733 }
  0x8e   : > { %721 = vrot.lane.b32.xlu0 %v683_v25, %s1499_s23 }
  0x90   : > { %959 = vrot.lane.b32.xlu2 %v824_v31, %s1501_s29 }
  0x92   : > { %v982_v63 = vpop.permute.xlu2 %981 }
  0x94   : > { %967 = vrot.lane.b32.xlu1 %v864_v38, %s1501_s29  ;;  %v1474_v38 = vld [vmem:[%s1940_s3] ss:$0 sm:$0xff] }
  0x96   : > { %961 = vrot.lane.b32.xlu0 %v834_v41, %s1501_s29  ;;  %v637_v43 = vpop.permute.xlu1 %636 }
  0x97   : > { %673 = vst.msk [vmem:[#allocation3 + $0x30] sm:$0xf] %vm660_vm4, %v637_v43 }
  0x98   : > { %v629_v44 = vpop.permute.xlu0 %628  ;;  %770 = vst.msk [vmem:[#allocation3 + $0x30] sm:$0xf] %vm757_vm5, %v734_v32  ;;  %969 = vrot.lane.b32.xlu2 %v874_v42, %s1501_s29 }
  0x99   : > { %669 = vst.msk [vmem:[#allocation3 + $0x20] sm:$0xf] %vm660_vm4, %v629_v44 }
  0x9a   : > { %766 = vst.msk [vmem:[#allocation3 + $0x20] sm:$0xf] %vm757_vm5, %v1782_v22  ;;  %v621_v36 = vpop.permute.xlu2 %620 }
  0x9b   : > { %1012 = vst.msk [vmem:[#allocation3 + $0x20] sm:$0xf] %vm1003_vm6, %v972_v24 }
  0x9c   : > { %665 = vst.msk [vmem:[#allocation3 + $0x10] sm:$0xf] %vm660_vm4, %v621_v36 }
  0x9e   : > { %v639_v37 = vpop.permute.xlu1 %638 }
  0x9f   : > { %674 = vst.msk [vmem:[#allocation3 + $0x34] sm:$0xf] %vm660_vm4, %v639_v37 }
  0xa0   : > { %771 = vst.msk [vmem:[#allocation3 + $0x34] sm:$0xf] %vm757_vm5, %v736_v28  ;;  %v631_v11 = vpop.permute.xlu0 %630 }
  0xa1   : > { %670 = vst.msk [vmem:[#allocation3 + $0x24] sm:$0xf] %vm660_vm4, %v631_v11 }
  0xa2   : > { %767 = vst.msk [vmem:[#allocation3 + $0x24] sm:$0xf] %vm757_vm5, %v1798_v3  ;;  %v712_v46 = vpop.permute.xlu2 %711  ;;  %v402_v3 = vld [vmem:[#allocation2 + $0x18] sm:$0xf] }
  0xa3   : > { %1017 = vst.msk [vmem:[#allocation3 + $0x34] sm:$0xf] %vm1003_vm6, %v982_v63 }
  0xa4   : > { %418 = vst.msk [vmem:[#allocation3 + $0x18] sm:$0xf] %vm374_vm0, %v402_v3 }
  0xa6   : > { %v980_v47 = vpop.permute.xlu1 %979 }
  0xa7   : > { %1016 = vst.msk [vmem:[#allocation3 + $0x30] sm:$0xf] %vm1003_vm6, %v980_v47 }
  0xa8   : > { %v974_v48 = vpop.permute.xlu0 %973 }
  0xa9   : > { %1013 = vst.msk [vmem:[#allocation3 + $0x24] sm:$0xf] %vm1003_vm6, %v974_v48 }
  0xaa   : > { %v956_v21 = vpop.permute.xlu2 %955 }
  0xae   : > { %v615_v58 = vpop.permute.xlu1 %614  ;;  %v1425_v52 = vld [vmem:[#allocation3 + $0x30] sm:$0xff] }
  0xaf   : > { %662 = vst.msk [vmem:[#allocation3 + $0x4] sm:$0xf] %vm660_vm4, %v615_v58  ;;  %1412 = vmatmul.msk.bf16.vlgmr.msra.gmra.mxu3 %vm1112_vm7, %v1425_v52 }
  0xb0   : > { %v613_v22 = vpop.permute.xlu0 %612  ;;  %v1423_v54 = vld [vmem:[#allocation3 + $0x20] sm:$0xff]  ;;  %759 = vst.msk [vmem:[#allocation3 + $0x4] sm:$0xf] %vm757_vm5, %v712_v46 }
  0xb1   : > { %661 = vst.msk [vmem:[#allocation3] sm:$0xf] %vm660_vm4, %v613_v22  ;;  %1410 = vmatmul.msk.bf16.vlgmr.msra.gmra.mxu2 %vm1112_vm7, %v1423_v54 }
  0xb2   : > { %v966_v60 = vpop.permute.xlu2 %965 }
  0xb6   : > { %v710_v57 = vpop.permute.xlu1 %709 }
  0xb7   : > { %758 = vst.msk [vmem:[#allocation3] sm:$0xf] %vm757_vm5, %v710_v57 }
  0xb8   : > { %v623_v4 = vpop.permute.xlu0 %622  ;;  %1004 = vst.msk [vmem:[#allocation3] sm:$0xf] %vm1003_vm6, %v956_v21 }
  0xb9   : > { %666 = vst.msk [vmem:[#allocation3 + $0x14] sm:$0xf] %vm660_vm4, %v623_v4 }
  0xba   : > { %v641_v62 = vpop.permute.xlu2 %640 }
  0xbb   : > { %675 = vst.msk [vmem:[#allocation3 + $0x38] sm:$0xf] %vm660_vm4, %v641_v62 }
  0xbe   : > { %v720_v0 = vpop.permute.xlu1 %719 }
  0xbf   : > { %763 = vst.msk [vmem:[#allocation3 + $0x14] sm:$0xf] %vm757_vm5, %v720_v0 }
  0xc0   : > { %v718_v1 = vpop.permute.xlu0 %717  ;;  %1009 = vst.msk [vmem:[#allocation3 + $0x14] sm:$0xf] %vm1003_vm6, %v966_v60 }
  0xc1   : > { %762 = vst.msk [vmem:[#allocation3 + $0x10] sm:$0xf] %vm757_vm5, %v718_v1 }
  0xc2   : > { %v732_v2 = vpop.permute.xlu2 %731 }
  0xc6   : > { %v964_v45 = vpop.permute.xlu1 %963 }
  0xc7   : > { %1008 = vst.msk [vmem:[#allocation3 + $0x10] sm:$0xf] %vm1003_vm6, %v964_v45 }
  0xc8   : > { %v958_v51 = vpop.permute.xlu0 %957 }
  0xc9   : > { %1005 = vst.msk [vmem:[#allocation3 + $0x4] sm:$0xf] %vm1003_vm6, %v958_v51 }
  0xca   : > { %v976_v7 = vpop.permute.xlu2 %975 }
  0xce   : > { %v635_v8 = vpop.permute.xlu1 %634  ;;  %v1421_v61 = vld [vmem:[#allocation3 + $0x10] sm:$0xff] }
  0xcf   : > { %672 = vst.msk [vmem:[#allocation3 + $0x2c] sm:$0xf] %vm660_vm4, %v635_v8  ;;  %1408 = vmatmul.msk.bf16.vlgmr.msra.gmra.mxu1 %vm1112_vm7, %v1421_v61 }
  0xd0   : > { %v633_v12 = vpop.permute.xlu0 %632  ;;  %v1419_v13 = vld [vmem:[#allocation3] sm:$0xff]  ;;  %769 = vst.msk [vmem:[#allocation3 + $0x2c] sm:$0xf] %vm757_vm5, %v732_v2 }
  0xd1   : > { %671 = vst.msk [vmem:[#allocation3 + $0x28] sm:$0xf] %vm660_vm4, %v633_v12  ;;  %1406 = vmatmul.msk.bf16.vlgmr.msra.gmra.mxu0 %vm1112_vm7, %v1419_v13 }
  0xd2   : > { %v986_v14 = vpop.permute.xlu2 %985 }
  0xd6   : > { %v730_v29 = vpop.permute.xlu1 %729 }
  0xd7   : > { %768 = vst.msk [vmem:[#allocation3 + $0x28] sm:$0xf] %vm757_vm5, %v730_v29 }
  0xd8   : > { %v643_v16 = vpop.permute.xlu0 %642  ;;  %1014 = vst.msk [vmem:[#allocation3 + $0x28] sm:$0xf] %vm1003_vm6, %v976_v7 }
  0xd9   : > { %676 = vst.msk [vmem:[#allocation3 + $0x3c] sm:$0xf] %vm660_vm4, %v643_v16 }
  0xda   : > { %v625_v10 = vpop.permute.xlu2 %624 }
  0xdb   : > { %667 = vst.msk [vmem:[#allocation3 + $0x18] sm:$0xf] %vm660_vm4, %v625_v10 }
  0xde   : > { %v740_v17 = vpop.permute.xlu1 %739 }
  0xdf   : > { %773 = vst.msk [vmem:[#allocation3 + $0x3c] sm:$0xf] %vm757_vm5, %v740_v17 }
  0xe0   : > { %v738_v18 = vpop.permute.xlu0 %737  ;;  %1019 = vst.msk [vmem:[#allocation3 + $0x3c] sm:$0xf] %vm1003_vm6, %v986_v14 }
  0xe1   : > { %772 = vst.msk [vmem:[#allocation3 + $0x38] sm:$0xf] %vm757_vm5, %v738_v18 }
  0xe2   : > { %v716_v15 = vpop.permute.xlu2 %715 }
  0xe6   : > { %v984_v19 = vpop.permute.xlu1 %983 }
  0xe7   : > { %1018 = vst.msk [vmem:[#allocation3 + $0x38] sm:$0xf] %vm1003_vm6, %v984_v19 }
  0xe8   : > { %v978_v40 = vpop.permute.xlu0 %977 }
  0xe9   : > { %1015 = vst.msk [vmem:[#allocation3 + $0x2c] sm:$0xf] %vm1003_vm6, %v978_v40 }
  0xea   : > { %v960_v26 = vpop.permute.xlu2 %959 }
  0xee   : > { %v619_v23 = vpop.permute.xlu1 %618  ;;  %v1426_v24 = vld [vmem:[#allocation3 + $0x38] sm:$0xff] }
  0xef   : > { %664 = vst.msk [vmem:[#allocation3 + $0xc] sm:$0xf] %vm660_vm4, %v619_v23  ;;  %1413 = vmatmul.msk.bf16.gmra.mxu3 %vm1112_vm7, %v1426_v24 }
  0xf0   : > { %v617_v25 = vpop.permute.xlu0 %616  ;;  %v1424_v55 = vld [vmem:[#allocation3 + $0x28] sm:$0xff]  ;;  %761 = vst.msk [vmem:[#allocation3 + $0xc] sm:$0xf] %vm757_vm5, %v716_v15 }
  0xf1   : > { %663 = vst.msk [vmem:[#allocation3 + $0x8] sm:$0xf] %vm660_vm4, %v617_v25  ;;  %1411 = vmatmul.msk.bf16.gmra.mxu2 %vm1112_vm7, %v1424_v55 }
  0xf2   : > { %v970_v30 = vpop.permute.xlu2 %969 }
  0xf6   : > { %v714_v20 = vpop.permute.xlu1 %713 }
  0xf7   : > { %760 = vst.msk [vmem:[#allocation3 + $0x8] sm:$0xf] %vm757_vm5, %v714_v20 }
  0xf8   : > { %v627_v28 = vpop.permute.xlu0 %626  ;;  %1006 = vst.msk [vmem:[#allocation3 + $0x8] sm:$0xf] %vm1003_vm6, %v960_v26 }
  0xf9   : > { %668 = vst.msk [vmem:[#allocation3 + $0x1c] sm:$0xf] %vm660_vm4, %v627_v28 }
  0xfe   : > { %v724_v31 = vpop.permute.xlu1 %723 }
  0xff   : > { %765 = vst.msk [vmem:[#allocation3 + $0x1c] sm:$0xf] %vm757_vm5, %v724_v31 }
 0x100   : > { %v722_v27 = vpop.permute.xlu0 %721  ;;  %1011 = vst.msk [vmem:[#allocation3 + $0x1c] sm:$0xf] %vm1003_vm6, %v970_v30 }
 0x101   : > { %764 = vst.msk [vmem:[#allocation3 + $0x18] sm:$0xf] %vm757_vm5, %v722_v27 }
 0x106   : > { %v968_v32 = vpop.permute.xlu1 %967 }
 0x107   : > { %1010 = vst.msk [vmem:[#allocation3 + $0x18] sm:$0xf] %vm1003_vm6, %v968_v32 }
 0x108   : > { %v962_v6 = vpop.permute.xlu0 %961 }
 0x109   : > { %1007 = vst.msk [vmem:[#allocation3 + $0xc] sm:$0xf] %vm1003_vm6, %v962_v6 }
 0x10e   : > { %v1422_v33 = vld [vmem:[#allocation3 + $0x18] sm:$0xff] }
 0x10f   : > { %1409 = vmatmul.msk.bf16.gmra.mxu1 %vm1112_vm7, %v1422_v33 }
 0x110   : > { %v1420_v35 = vld [vmem:[#allocation3 + $0x8] sm:$0xff] }
 0x111   : > { %1407 = vmatmul.msk.bf16.gmra.mxu0 %vm1112_vm7, %v1420_v35 }
 0x132   : > { %v1176_v39 = vpop.f32.mrf.mxu3 }
 0x133   : > { %v1177_v63 = vadd.f32 %v1474_v38, %v1176_v39 }
 0x134   : > { %v1166_v41 = vpop.f32.mrf.mxu2 }
 0x135   : > { %v1167_v42 = vadd.f32 %v1474_v38, %v1166_v41  ;;  %1198 = vst [vmem:[%s1910_s21 + $0x60] sm:$0xff] %v1177_v63 }
 0x137   : > { %1194 = vst [vmem:[%s1910_s21 + $0x40] sm:$0xff] %v1167_v42 }
 0x13a   : > { %v1178_v43 = vpop.f32.mrf.mxu3 }
 0x13b   : > { %v1179_v44 = vadd.f32 %v1474_v38, %v1178_v43 }
 0x13c   : > { %v1168_v36 = vpop.f32.mrf.mxu2 }
 0x13d   : > { %v1169_v49 = vadd.f32 %v1474_v38, %v1168_v36  ;;  %1199 = vst [vmem:[%s1910_s21 + $0x68] sm:$0xff] %v1179_v44 }
 0x13f   : > { %1195 = vst [vmem:[%s1910_s21 + $0x48] sm:$0xff] %v1169_v49 }
 0x14c   : > { %v1156_v37 = vpop.f32.mrf.mxu1 }
 0x14d   : > { %v1157_v11 = vadd.f32 %v1474_v38, %v1156_v37 }
 0x14e   : > { %v1146_v46 = vpop.f32.mrf.mxu0 }
 0x14f   : > { %v1147_v47 = vadd.f32 %v1474_v38, %v1146_v46  ;;  %1190 = vst [vmem:[%s1910_s21 + $0x20] sm:$0xff] %v1157_v11 }
 0x151   : > { %1186 = vst [vmem:[%s1910_s21] sm:$0xff] %v1147_v47 }
 0x154   : > { %v1158_v48 = vpop.f32.mrf.mxu1 }
 0x155   : > { %v1159_v50 = vadd.f32 %v1474_v38, %v1158_v48 }
 0x156   : > { %v1148_v56 = vpop.f32.mrf.mxu0 }
 0x157   : > { %v1149_v21 = vadd.f32 %v1474_v38, %v1148_v56  ;;  %1191 = vst [vmem:[%s1910_s21 + $0x28] sm:$0xff] %v1159_v50 }
 0x159   : > { %1187 = vst [vmem:[%s1910_s21 + $0x8] sm:$0xff] %v1149_v21 }
 0x172   : > { %v1181_v58 = vpop.f32.mrf.mxu3 }
 0x173   : > { %v1182_v52 = vadd.f32 %v1474_v38, %v1181_v58 }
 0x174   : > { %v1171_v53 = vpop.f32.mrf.mxu2 }
 0x175   : > { %v1172_v22 = vadd.f32 %v1474_v38, %v1171_v53  ;;  %1200 = vst [vmem:[%s1910_s21 + $0x70] sm:$0xff] %v1182_v52 }
 0x177   : > { %1196 = vst [vmem:[%s1910_s21 + $0x50] sm:$0xff] %v1172_v22 }
 0x17a   : > { %v1183_v54 = vpop.f32.mrf.mxu3 }
 0x17b   : > { %v1184_v60 = vadd.f32 %v1474_v38, %v1183_v54 }
 0x17c   : > { %v1173_v57 = vpop.f32.mrf.mxu2 }
 0x17d   : > { %v1174_v59 = vadd.f32 %v1474_v38, %v1173_v57  ;;  %1201 = vst [vmem:[%s1910_s21 + $0x78] sm:$0xff] %v1184_v60 }
 0x17f   : > { %1197 = vst [vmem:[%s1910_s21 + $0x58] sm:$0xff] %v1174_v59 }
 0x18c   : > { %v1161_v4 = vpop.f32.mrf.mxu1 }
 0x18d   : > { %v1162_v62 = vadd.f32 %v1474_v38, %v1161_v4 }
 0x18e   : > { %v1151_v0 = vpop.f32.mrf.mxu0 }
 0x18f   : > { %v1152_v1 = vadd.f32 %v1474_v38, %v1151_v0  ;;  %1192 = vst [vmem:[%s1910_s21 + $0x30] sm:$0xff] %v1162_v62 }
 0x191   : > { %1188 = vst [vmem:[%s1910_s21 + $0x10] sm:$0xff] %v1152_v1 }
 0x194   : > { %v1163_v2 = vpop.f32.mrf.mxu1 }
 0x195   : > { %v1164_v45 = vadd.f32 %v1474_v38, %v1163_v2 }
 0x196   : > { %v1153_v51 = vpop.f32.mrf.mxu0 }
 0x197   : > { %v1154_v3 = vadd.f32 %v1474_v38, %v1153_v51  ;;  %1193 = vst [vmem:[%s1910_s21 + $0x38] sm:$0xff] %v1164_v45 }
 0x199   : > { %1189 = vst [vmem:[%s1910_s21 + $0x18] sm:$0xff] %v1154_v3 }
 0x19a PF: > { %s14_s17 = sadd.s32 1, %s1497_s17   ;;  %s1944_s15 = smov %s1493_s16 }
 0x19b   : > { %p11_p5 = scmp.ge.s32.totalorder %s14_s17, 4   ;;  %s1945_s16 = smov %s1947_s18 }
 0x19d   :  { %13 = sbr.rel (!%p11_p5) target bundleno = 2 (0x2), region = 79 }

</bundles_post_ra>
